<compile_context>
chip_gen: v7x
topology: tpu7x:2x2x1
jax: 0.10.0
libtpu: 0.0.40
codegen_flags: <defaults>
</compile_context>

<pallas_src>
import jax
import jax.numpy as jnp
import numpy as np
from jax.experimental import pallas as pl
from jax.experimental.pallas import tpu as pltpu


def make_mlp_kernel(n_layers, compute_dtype):
    """Fused MLP kernel. Kernel args: (x, w0, b0, ..., w_{L-1}, b_{L-1}, out)."""

    def kernel(x_ref, *refs):
        o_ref = refs[-1]
        p_refs = refs[:-1]                      # interleaved (w_l, b_l) refs
        # In-kernel cast to the MXU feed dtype: a VPU cast that is free in a
        # memory-bound kernel and avoids a separate XLA cast pass over HBM.
        h = x_ref[...].astype(compute_dtype)
        for l in range(n_layers):
            w = p_refs[2 * l][...]
            b = p_refs[2 * l + 1][...]          # (1, out_f), lane-aligned
            # MXU dot with f32 accumulation; bias add / ReLU stay in f32
            # (v5e VPU has no bf16 arithmetic).
            acc = jnp.dot(h, w, preferred_element_type=jnp.float32)
            acc = acc + b.astype(jnp.float32)
            if l < n_layers - 1:
                acc = jnp.maximum(acc, 0.0)     # ReLU on the VPU
                h = acc.astype(compute_dtype)   # back to MXU feed dtype
            else:
                o_ref[...] = acc.astype(o_ref.dtype)

    return kernel


def prepare_policy_params(weights, biases, compute_dtype=jnp.float32):
    """One-time parameter prep, hoisted out of the per-call forward path."""
    weights_c = tuple(jnp.asarray(w, compute_dtype) for w in weights)
    biases_2d = tuple(jnp.asarray(b, jnp.float32).reshape(1, -1) for b in biases)
    return weights_c, biases_2d


def _round_up(x, m):
    return ((x + m - 1) // m) * m


def _padded_bytes(rows, cols, itemsize):
    sub = 8 * max(1, 4 // itemsize)
    return _round_up(max(int(rows), 1), sub) * _round_up(max(int(cols), 1), 128) * itemsize


def discrete_policy_forward(obs, prepared_params, *, compute_dtype=jnp.float32,
                            batch_tile=None, tile_cap=8192):
    """obs: (B, obs_dim). prepared_params from prepare_policy_params()."""
    weights_c, biases_2d = prepared_params
    B, obs_dim = obs.shape
    n_layers = len(weights_c)
    out_dims = [int(w.shape[1]) for w in weights_c]
    act_dim = out_dims[-1]
    out_dtype = obs.dtype

    obs_itemsize = jnp.dtype(obs.dtype).itemsize
    out_itemsize = jnp.dtype(out_dtype).itemsize
    w_itemsize = jnp.dtype(compute_dtype).itemsize
    # Sublane granularity for tiling the batch axis (8 rows/vreg for 32-bit,
    # 16 for 16-bit packed dtypes on the streamed obs).
    sublane = 8 * max(1, 4 // obs_itemsize)

    # --- batch tile selection ------------------------------------------------
    if batch_tile is not None:
        tb = min(int(batch_tile), B)
        if tb < B and tb % sublane != 0:
            raise ValueError(
                f"batch_tile={tb} must be a multiple of {sublane} for "
                f"{jnp.dtype(obs.dtype).name} obs (or >= batch)")
    else:
        if B <= 2 * sublane:
            tb = B                          # too small to split; single tile
        elif B <= tile_cap:
            # >=2 even-ish tiles -> megacore-shardable on v7x, pipelined obs.
            tb = min(_round_up(pl.cdiv(B, 2), sublane), B)
        else:
            tb = tile_cap                   # big tiles: step count, not BW, limits

    num_tiles = pl.cdiv(B, tb)
    grid = (num_tiles,)

    # --- BlockSpecs: obs/out tiled over the batch grid, params fully resident.
    in_specs = [pl.BlockSpec((tb, obs_dim), lambda i: (i, 0))]
    for w, b in zip(weights_c, biases_2d):
        in_f, out_f = int(w.shape[0]), int(w.shape[1])
        in_specs.append(pl.BlockSpec((in_f, out_f), lambda i: (0, 0)))
        in_specs.append(pl.BlockSpec((1, out_f), lambda i: (0, 0)))

    # TODO(synk): act_dim=8 means masked (narrow) output stores; a lane-dense
    # repack (transposed y^T = W @ x^T layout) only pays off if the obs can be
    # supplied transposed and store time shows up in profiles at this size.
    out_spec = pl.BlockSpec((tb, act_dim), lambda i: (i, 0))

    # --- explicit VMEM budget (double-buffered, tile-padded), capped well
    # under v7x's 64 MiB physical VMEM.
    param_bytes = 0
    for w, b in zip(weights_c, biases_2d):
        param_bytes += 2 * _padded_bytes(w.shape[0], w.shape[1], w_itemsize)
        param_bytes += 2 * _padded_bytes(1, b.shape[1], 4)
    io_bytes = (2 * _padded_bytes(tb, obs_dim, obs_itemsize)
                + 2 * _padded_bytes(tb, act_dim, out_itemsize))
    act_bytes = 2 * _padded_bytes(tb, max(out_dims), 4)
    est = param_bytes + io_bytes + act_bytes
    vmem_limit = int(min(max(2 * est, 8 << 20), 40 << 20))

    # --- advisory cost estimate for XLA's scheduler.
    flops = 2 * B * sum(int(w.shape[0]) * int(w.shape[1]) for w in weights_c)
    bytes_accessed = (B * obs_dim * obs_itemsize + B * act_dim * out_itemsize
                      + sum(int(w.size) * w_itemsize for w in weights_c)
                      + sum(int(b.size) * 4 for b in biases_2d))
    cost = pl.CostEstimate(flops=flops, transcendentals=0,
                           bytes_accessed=bytes_accessed)

    fn = pl.pallas_call(
        make_mlp_kernel(n_layers, compute_dtype),
        out_shape=jax.ShapeDtypeStruct((B, act_dim), out_dtype),
        grid_spec=pltpu.PrefetchScalarGridSpec(
            num_scalar_prefetch=0,
            grid=grid,
            in_specs=in_specs,
            out_specs=out_spec,
        ),
        compiler_params=pltpu.CompilerParams(
            dimension_semantics=("parallel",),
            vmem_limit_bytes=vmem_limit,
        ),
        cost_estimate=cost,
    )

    args = [obs]
    for w, b in zip(weights_c, biases_2d):
        args.extend([w, b])
    return fn(*args)


def reference_forward(obs, weights, biases):
    h = obs
    n = len(weights)
    for l, (w, b) in enumerate(zip(weights, biases)):
        h = h @ w + b
        if l < n - 1:
            h = jnp.maximum(h, 0.0)
    return h


if __name__ == "__main__":
    # Module config: discreate_policy(obs_dim=16, act_dim=8, hidden_sizes=(32, 32))
    obs_dim, act_dim = 16, 8
    hidden_sizes = (32, 32)

    key = jax.random.PRNGKey(0)
    k_obs1, k_obs2, k_obs3, *k_params = jax.random.split(
        key, 3 + 2 * (len(hidden_sizes) + 1))

    dims = (obs_dim,) + tuple(hidden_sizes) + (act_dim,)
    weights, biases = [], []
    for l in range(len(dims) - 1):
        in_f, out_f = dims[l], dims[l + 1]
        weights.append(0.1 * jax.random.normal(k_params[2 * l], (in_f, out_f), jnp.float32))
        biases.append(0.1 * jax.random.normal(k_params[2 * l + 1], (out_f,), jnp.float32))

    # One-time parameter prep (hoisted out of the forward path).
    params_f32 = prepare_policy_params(weights, biases, compute_dtype=jnp.float32)
    params_bf16 = prepare_policy_params(weights, biases, compute_dtype=jnp.bfloat16)

    # --- Test 1: small batch, f32 compute, single full-batch tile. Strict numerics.
    obs1 = jax.random.normal(k_obs1, (8, obs_dim), dtype=jnp.float32)
    out1 = jax.block_until_ready(
        discrete_policy_forward(obs1, params_f32, compute_dtype=jnp.float32))
    ref1 = reference_forward(obs1, weights, biases)
    assert out1.shape == (8, act_dim)
    np.testing.assert_allclose(np.asarray(out1), np.asarray(ref1), rtol=1e-5, atol=1e-5)

    # --- Test 2: moderate batch auto-split into 2 aligned tiles (tb=104, incl.
    # padded last tile), f32 compute. Strict numerics.
    obs2 = jax.random.normal(k_obs2, (200, obs_dim), dtype=jnp.float32)
    out2 = jax.block_until_ready(
        discrete_policy_forward(obs2, params_f32, compute_dtype=jnp.float32))
    ref2 = reference_forward(obs2, weights, biases)
    assert out2.shape == (200, act_dim)
    np.testing.assert_allclose(np.asarray(out2), np.asarray(ref2), rtol=1e-5, atol=1e-5)

    # --- Test 3: explicit tiling + in-kernel bf16 MXU feed (f32 obs streamed,
    # cast inside the kernel). Loose tolerance vs f32 reference.
    obs3 = jax.random.normal(k_obs3, (200, obs_dim), dtype=jnp.float32)
    out3 = jax.block_until_ready(
        discrete_policy_forward(obs3, params_bf16, batch_tile=64,
                                compute_dtype=jnp.bfloat16))
    ref3 = reference_forward(obs3, weights, biases)
    assert out3.shape == (200, act_dim)
    np.testing.assert_allclose(np.asarray(out3), np.asarray(ref3), rtol=3e-2, atol=3e-2)

    # TODO(synk): `kl()` is a training-time loss helper (not part of forward); not kernelized.
    print("KERNEL_OK")
</pallas_src>

<mosaic_0001>
module attributes {stable_mosaic.version = 11 : i64} {
  func.func @kernel(%arg0: i32, %arg1: memref<8x16xf32, #tpu.memory_space<vmem>>, %arg2: memref<16x32xf32, #tpu.memory_space<vmem>>, %arg3: memref<1x32xf32, #tpu.memory_space<vmem>>, %arg4: memref<32x32xf32, #tpu.memory_space<vmem>>, %arg5: memref<1x32xf32, #tpu.memory_space<vmem>>, %arg6: memref<32x8xf32, #tpu.memory_space<vmem>>, %arg7: memref<1x8xf32, #tpu.memory_space<vmem>>, %arg8: memref<8x8xf32, #tpu.memory_space<vmem>>) attributes {dimension_semantics = [#tpu.dimension_semantics<parallel>], iteration_bounds = array<i64: 1>, scalar_prefetch = 0 : i64, scratch_operands = 0 : i64, tpu.core_type = #tpu.core_type<tc>, window_params = [{transform_indices = @transform_0, window_bounds = array<i64: 8, 16>}, {pipeline_mode = #tpu.pipeline_mode<synchronous>, transform_indices = @transform_1, window_bounds = array<i64: 16, 32>}, {pipeline_mode = #tpu.pipeline_mode<synchronous>, transform_indices = @transform_2, window_bounds = array<i64: 1, 32>}, {pipeline_mode = #tpu.pipeline_mode<synchronous>, transform_indices = @transform_3, window_bounds = array<i64: 32, 32>}, {pipeline_mode = #tpu.pipeline_mode<synchronous>, transform_indices = @transform_4, window_bounds = array<i64: 1, 32>}, {pipeline_mode = #tpu.pipeline_mode<synchronous>, transform_indices = @transform_5, window_bounds = array<i64: 32, 8>}, {pipeline_mode = #tpu.pipeline_mode<synchronous>, transform_indices = @transform_6, window_bounds = array<i64: 1, 8>}, {transform_indices = @transform_7, window_bounds = array<i64: 8, 8>}]} {
    %c0 = arith.constant 0 : index
    %c0_0 = arith.constant 0 : index
    %0 = vector.load %arg1[%c0, %c0_0] : memref<8x16xf32, #tpu.memory_space<vmem>>, vector<8x16xf32>
    %c0_1 = arith.constant 0 : index
    %c0_2 = arith.constant 0 : index
    %1 = vector.load %arg2[%c0_1, %c0_2] : memref<16x32xf32, #tpu.memory_space<vmem>>, vector<16x32xf32>
    %c0_3 = arith.constant 0 : index
    %c0_4 = arith.constant 0 : index
    %2 = vector.load %arg3[%c0_3, %c0_4] : memref<1x32xf32, #tpu.memory_space<vmem>>, vector<1x32xf32>
    %cst = arith.constant dense<0.000000e+00> : vector<8x32xf32>
    %3 = tpu.matmul %0, %1, %cst {dimension_numbers = #tpu.dot_dimension_numbers<[1], [0], [0], [1], [0, 0, 1, 1], [], []>} : vector<8x16xf32>, vector<16x32xf32>, vector<8x32xf32> -> vector<8x32xf32>
    %4 = vector.broadcast %2 : vector<1x32xf32> to vector<8x32xf32>
    %5 = arith.addf %3, %4 : vector<8x32xf32>
    %cst_5 = arith.constant 0.000000e+00 : f32
    %6 = vector.broadcast %cst_5 : f32 to vector<8x32xf32>
    %7 = arith.maximumf %5, %6 : vector<8x32xf32>
    %c0_6 = arith.constant 0 : index
    %c0_7 = arith.constant 0 : index
    %8 = vector.load %arg4[%c0_6, %c0_7] : memref<32x32xf32, #tpu.memory_space<vmem>>, vector<32x32xf32>
    %c0_8 = arith.constant 0 : index
    %c0_9 = arith.constant 0 : index
    %9 = vector.load %arg5[%c0_8, %c0_9] : memref<1x32xf32, #tpu.memory_space<vmem>>, vector<1x32xf32>
    %cst_10 = arith.constant dense<0.000000e+00> : vector<8x32xf32>
    %10 = tpu.matmul %7, %8, %cst_10 {dimension_numbers = #tpu.dot_dimension_numbers<[1], [0], [0], [1], [0, 0, 1, 1], [], []>} : vector<8x32xf32>, vector<32x32xf32>, vector<8x32xf32> -> vector<8x32xf32>
    %11 = vector.broadcast %9 : vector<1x32xf32> to vector<8x32xf32>
    %12 = arith.addf %10, %11 : vector<8x32xf32>
    %cst_11 = arith.constant 0.000000e+00 : f32
    %13 = vector.broadcast %cst_11 : f32 to vector<8x32xf32>
    %14 = arith.maximumf %12, %13 : vector<8x32xf32>
    %c0_12 = arith.constant 0 : index
    %c0_13 = arith.constant 0 : index
    %15 = vector.load %arg6[%c0_12, %c0_13] : memref<32x8xf32, #tpu.memory_space<vmem>>, vector<32x8xf32>
    %c0_14 = arith.constant 0 : index
    %c0_15 = arith.constant 0 : index
    %16 = vector.load %arg7[%c0_14, %c0_15] : memref<1x8xf32, #tpu.memory_space<vmem>>, vector<1x8xf32>
    %cst_16 = arith.constant dense<0.000000e+00> : vector<8x8xf32>
    %17 = tpu.matmul %14, %15, %cst_16 {dimension_numbers = #tpu.dot_dimension_numbers<[1], [0], [0], [1], [0, 0, 1, 1], [], []>} : vector<8x32xf32>, vector<32x8xf32>, vector<8x8xf32> -> vector<8x8xf32>
    %18 = vector.broadcast %16 : vector<1x8xf32> to vector<8x8xf32>
    %19 = arith.addf %17, %18 : vector<8x8xf32>
    %c0_17 = arith.constant 0 : index
    %c0_18 = arith.constant 0 : index
    %20 = vector.load %arg8[%c0_17, %c0_18] : memref<8x8xf32, #tpu.memory_space<vmem>>, vector<8x8xf32>
    tpu.vector_store %arg8[%c0_17, %c0_18], %19 {strides = array<i32>} : memref<8x8xf32, #tpu.memory_space<vmem>>, vector<8x8xf32>,
    return
  }
  func.func @transform_0(%arg0: i32) -> (i32, i32) {
    %c0_i32 = arith.constant 0 : i32
    %c0_i32_0 = arith.constant 0 : i32
    return %arg0, %c0_i32 : i32, i32
  }
  func.func @transform_1(%arg0: i32) -> (i32, i32) {
    %c0_i32 = arith.constant 0 : i32
    %c0_i32_0 = arith.constant 0 : i32
    %c0_i32_1 = arith.constant 0 : i32
    return %c0_i32, %c0_i32_0 : i32, i32
  }
  func.func @transform_2(%arg0: i32) -> (i32, i32) {
    %c0_i32 = arith.constant 0 : i32
    %c0_i32_0 = arith.constant 0 : i32
    %c0_i32_1 = arith.constant 0 : i32
    return %c0_i32, %c0_i32_0 : i32, i32
  }
  func.func @transform_3(%arg0: i32) -> (i32, i32) {
    %c0_i32 = arith.constant 0 : i32
    %c0_i32_0 = arith.constant 0 : i32
    %c0_i32_1 = arith.constant 0 : i32
    return %c0_i32, %c0_i32_0 : i32, i32
  }
  func.func @transform_4(%arg0: i32) -> (i32, i32) {
    %c0_i32 = arith.constant 0 : i32
    %c0_i32_0 = arith.constant 0 : i32
    %c0_i32_1 = arith.constant 0 : i32
    return %c0_i32, %c0_i32_0 : i32, i32
  }
  func.func @transform_5(%arg0: i32) -> (i32, i32) {
    %c0_i32 = arith.constant 0 : i32
    %c0_i32_0 = arith.constant 0 : i32
    %c0_i32_1 = arith.constant 0 : i32
    return %c0_i32, %c0_i32_0 : i32, i32
  }
  func.func @transform_6(%arg0: i32) -> (i32, i32) {
    %c0_i32 = arith.constant 0 : i32
    %c0_i32_0 = arith.constant 0 : i32
    %c0_i32_1 = arith.constant 0 : i32
    return %c0_i32, %c0_i32_0 : i32, i32
  }
  func.func @transform_7(%arg0: i32) -> (i32, i32) {
    %c0_i32 = arith.constant 0 : i32
    %c0_i32_0 = arith.constant 0 : i32
    return %arg0, %c0_i32 : i32, i32
  }
}

</mosaic_0001>

<bundles_post_ra>
// kernel: tpu_custom_call.1
= control target key start
LH: loop header
LB: loop body
LE: loop exit
PB: predicated region body
PF: predicated region fallthrough
CT: control target
= control target key end

     0   :  { %12 = vsyncpa [#allocation3], 0  ;;  %s538_s0 = inlined_call_operand.hbm [shape: f32[8,16], index: 0, kind: input, shape index: {}]   ;;  %s539_s1 = inlined_call_operand.vmem [shape: f32[16,32], index: 1, kind: input, shape index: {}]   ;;  %s540_s2 = inlined_call_operand.vmem [shape: f32[1,32], index: 2, kind: input, shape index: {}]   ;;  %s541_s3 = inlined_call_operand.vmem [shape: f32[32,32], index: 3, kind: input, shape index: {}]   ;;  %s542_s4 = inlined_call_operand.vmem [shape: f32[1,32], index: 4, kind: input, shape index: {}]   ;;  %s543_s5 = inlined_call_operand.vmem [shape: f32[32,8], index: 5, kind: input, shape index: {}]   ;;  %s544_s6 = inlined_call_operand.vmem [shape: f32[1,8], index: 6, kind: input, shape index: {}]   ;;  %s545_s7 = inlined_call_operand.hbm [shape: f32[8,8], index: 7, kind: output, shape index: {}]  }
   0x1   :  { %13 = vsyncpa [#allocation4], 0  ;;  %s427_s24 = smov [#allocation2]   ;;  %s379_s28 = scalar_lea.hbm %s538_s0, 128 }
   0x2   :  { %s20_s25 = sshll.u32 %s427_s24, 4  ;;  %p380_p0 = scmp.ne.s32.totalorder %s538_s0, %s379_s28  ;;  %s21_s25 = int_to_ptr.vmem [resolvable:$true] %s20_s25 }
   0x3   :  { %p383_p1 = scmp.lt.u32.totalorder %s379_s28, %s538_s0 }
   0x5   :  { %p385_p2 = pnand %p383_p1, %p380_p0 }
   0x7   :  { %388 = shalt.err (!%p385_p2)
}
   0x8   :  { %s389_s10 = scalar_lea.vmem %s21_s25, 128  ;;  %p394_p4 = scmp.lt.s32.totalorder %s21_s25, %s21_s25 }
   0x9   :  { %p390_p3 = scmp.ne.s32.totalorder %s21_s25, %s389_s10  ;;  %p395_p5 = scmp.lt.s32.totalorder %s389_s10, %s389_s10 }
   0xb   :  { %p396_p6 = por %p395_p5, %p394_p4 }
   0xd   :  { %p397_p7 = pnand %p396_p6, %p390_p3 }
   0xf   :  { %400 = shalt.err (!%p397_p7)
}
  0x10   :  { %23 = dma.hbm_to_vmem [thread:$0]  %s538_s0, 128, %s21_s25, [#allocation3]  }
  0x11   :  { %423 = dma.done.wait [#allocation3], 128  }
  0x12   :  { %424 = vsyncadd [#allocation3], 4294967168  ;;  %v428_v0 = vmov 0.0|0.0   ;;  %vm429_vm0 = vmmov 0   ;;  %v430_v1 = vmov 0.0   ;;  %v40_v2 = vld [vmem:[%s539_s1] sm:$0xff] }
  0x13   :  { %359 = vmatprep.subr.bf16.mxu0 %v428_v0  ;;  %334 = vmatprep.mubr.msk.f32.mxu0 %vm429_vm0, %v430_v1  ;;  %v41_v3 = vld [vmem:[%s539_s1 + $0x8] sm:$0xff]  ;;  %v124_v5 = vld [vmem:[%s541_s3] sm:$0xff]  ;;  %vm49_vm1 = vcmask 130048   ;;  %v126_v9 = vld [vmem:[%s541_s3 + $0x10] sm:$0xff]  ;;  %vm135_vm2 = vcmask 261120   ;;  %s431_s12 = smov [#allocation5]  }
  0x14   :  { %362 = vmatprep.subr.bf16.mxu1 %v428_v0  ;;  %345 = vmatprep.mubr.msk.f32.mxu1 %vm429_vm0, %v430_v1  ;;  %v360_v4 = vpack.c.bf16 %v41_v3, %v40_v2  ;;  %v125_v6 = vld [vmem:[%s541_s3 + $0x8] sm:$0xff]  ;;  %v39_v8 = vld [vmem:[#allocation2] sm:$0xff]  ;;  %v127_v10 = vld [vmem:[%s541_s3 + $0x18] sm:$0xff]  ;;  %s302_s13 = sshll.u32 %s431_s12, 4  ;;  %vm294_vm3 = vcmask 64512   ;;  %s303_s13 = int_to_ptr.vmem [resolvable:$true] %s302_s13 }
  0x15   :  { %v363_v7 = vpack.c.bf16 %v125_v6, %v124_v5  ;;  %v366_v11 = vpack.c.bf16 %v127_v10, %v126_v9  ;;  %v210_v12 = vld [vmem:[%s543_s5] sm:$0xff]  ;;  %v211_v13 = vld [vmem:[%s543_s5 + $0x8] sm:$0xff]  ;;  %v212_v20 = vld [vmem:[%s543_s5 + $0x10] sm:$0xff]  ;;  %p406_p9 = scmp.lt.s32.totalorder %s303_s13, %s303_s13 }
  0x16   :  { %361 = vmatpush3.bf16.msra.mxu0 %v360_v4  ;;  %v369_v14 = vpack.c.bf16 %v211_v13, %v210_v12  ;;  %v311_v15 = vld [vmem:[%s540_s2] ss:$0 sm:$0xff]  ;;  %v213_v21 = vld [vmem:[%s543_s5 + $0x18] sm:$0xff]  ;;  %s401_s5 = scalar_lea.vmem %s303_s13, 128 }
  0x17   :  { %364 = vmatpush3.bf16.msra.mxu1 %v363_v7  ;;  %368 = vmatprep.subr.bf16.mxu0 %v428_v0  ;;  %v372_v22 = vpack.c.bf16 %v213_v21, %v212_v20  ;;  %v313_v23 = vld [vmem:[%s542_s4] ss:$0 sm:$0xff]  ;;  %p402_p8 = scmp.ne.s32.totalorder %s303_s13, %s401_s5  ;;  %p407_p10 = scmp.lt.s32.totalorder %s401_s5, %s401_s5 }
  0x18   :  { %365 = vmatprep.subr.bf16.mxu1 %v428_v0  ;;  %v315_v28 = vld [vmem:[%s544_s6] ss:$0 sm:$0xff] }
  0x19   :  { %335 = vmatmul.mubr.msk.f32.vlgmr.msra.gmra.mrb[0].mxu0 %vm49_vm1, %v39_v8  ;;  %p408_p11 = por %p407_p10, %p406_p9 }
  0x1a   :  { %356 = vmatprep.mubr.msk.f32.mxu0 %vm429_vm0, %v430_v1  ;;  %370 = vmatpush3.bf16.msra.mxu0 %v369_v14 }
  0x1b   :  { %367 = vmatpush3.bf16.msra.mxu1 %v366_v11  ;;  %371 = vmatprep.subr.bf16.mxu0 %v428_v0  ;;  %p409_p12 = pnand %p408_p11, %p402_p8 }
  0x1e   :  { %373 = vmatpush3.bf16.msra.mxu0 %v372_v22 }
  0xec   :  { %v119_v16 = vpop.f32.mrb[0].mxu0 }
  0xed   :  { %v120_v17 = vadd.f32 %v311_v15, %v119_v16  ;;  %v336_v18 = vpop.f32.mrb[1].mxu0 }
  0xef   :  { %v123_v19 = vmax.f32 %v120_v17, 0.0 }
  0xf1   :  { %346 = vmatmul.mubr.msk.f32.vlgmr.msra.gmra.mrb[0].mxu1 %vm135_vm2, %v123_v19 }
 0x1c4   :  { %v205_v24 = vpop.f32.mrb[0].mxu1 }
 0x1c5   :  { %v206_v25 = vadd.f32 %v313_v23, %v205_v24  ;;  %v347_v26 = vpop.f32.mrb[1].mxu1 }
 0x1c7   :  { %v209_v27 = vmax.f32 %v206_v25, 0.0 }
 0x1c9   :  { %357 = vmatmul.mubr.msk.f32.vlgmr.msra.gmra.mrb[2].mxu0 %vm135_vm2, %v209_v27 }
 0x29c   :  { %v290_v29 = vpop.f32.mrb[2].mxu0 }
 0x29d   :  { %v291_v30 = vadd.f32 %v315_v28, %v290_v29  ;;  %v358_v31 = vpop.f32.mrb[3].mxu0 }
 0x29f   :  { %295 = vst.msk [vmem:[#allocation5] sm:$0xff] %vm294_vm3, %v291_v30 }
 0x2a0   :  { %412 = shalt.err (!%p409_p12)
}
 0x2a1   :  { %s413_s15 = scalar_lea.hbm %s545_s7, 128 }
 0x2a2   :  { %p414_p13 = scmp.ne.s32.totalorder %s545_s7, %s413_s15  ;;  %p417_p0 = scmp.lt.u32.totalorder %s413_s15, %s545_s7 }
 0x2a4   :  { %p419_p1 = pnand %p417_p0, %p414_p13 }
 0x2a6   :  { %422 = shalt.err (!%p419_p1)
}
 0x2a7   :  { %305 = dma.vmem_to_hbm [thread:$0]  %s303_s13, 128, %s545_s7, [#allocation4]  }
 0x2a8   :  { %425 = dma.done.wait [#allocation4], 128  }
 0x2a9   :  { %426 = vsyncadd [#allocation4], 4294967168 }
 0x2aa   :  { %309 = vsyncpa [#allocation3], 1 }
 0x2ab   :  { %310 = vsyncpa [#allocation4], 1 }

</bundles_post_ra>
